<compile_context>
chip_gen: v7x
topology: tpu7x:2x2x1
jax: 0.10.0
libtpu: 0.0.40
codegen_flags: <defaults>
</compile_context>

<pallas_src>
import jax
import jax.numpy as jnp
from jax.experimental import pallas as pl
from jax.experimental.pallas import tpu as pltpu


def _patch_embed_kernel(x_ref, w_ref, b_ref, o_ref):
    # (tile_m, K) @ (K, E) on the MXU in the operands' native dtype,
    # f32 accumulation, bias add in f32, cast to output dtype.
    acc = jnp.dot(x_ref[...], w_ref[...], preferred_element_type=jnp.float32)
    acc = acc + b_ref[...].astype(jnp.float32)
    o_ref[...] = acc.astype(o_ref.dtype)


def _round_up(a, b):
    return ((a + b - 1) // b) * b


def _build_call(M_pad, K, E, tile_m, out_dtype, elem_bytes, weight_mode):
    if weight_mode is None:
        w_spec = pl.BlockSpec((K, E), lambda i: (0, 0))
        b_spec = pl.BlockSpec((1, E), lambda i: (0, 0))
    else:
        # Constant index_map -> weights stay resident; single-buffer them.
        w_spec = pl.BlockSpec((K, E), lambda i: (0, 0), pipeline_mode=weight_mode)
        b_spec = pl.BlockSpec((1, E), lambda i: (0, 0), pipeline_mode=weight_mode)

    # Rough VMEM footprint: resident weights + double-buffered x/out tiles.
    # Clamp to [16 MiB, 48 MiB]: above v5e's 16 MiB default scoped limit when
    # needed, comfortably under v7x's 64 MiB physical VMEM.
    vmem_needed = (K * E + 8 * E + 2 * tile_m * K + 2 * tile_m * E) * elem_bytes
    vmem_limit = int(min(48 * 1024 * 1024, max(16 * 1024 * 1024, 4 * vmem_needed)))

    cost = pl.CostEstimate(
        flops=2 * M_pad * K * E,
        transcendentals=0,
        bytes_accessed=(M_pad * K + K * E + E + M_pad * E) * elem_bytes,
    )

    return pl.pallas_call(
        _patch_embed_kernel,
        out_shape=jax.ShapeDtypeStruct((M_pad, E), out_dtype),
        grid_spec=pltpu.PrefetchScalarGridSpec(
            num_scalar_prefetch=0,
            grid=(M_pad // tile_m,),
            in_specs=[
                pl.BlockSpec((tile_m, K), lambda i: (i, 0)),
                w_spec,
                b_spec,
            ],
            out_specs=pl.BlockSpec((tile_m, E), lambda i: (i, 0)),
        ),
        compiler_params=pltpu.CompilerParams(
            dimension_semantics=("parallel",),
            vmem_limit_bytes=vmem_limit,
        ),
        cost_estimate=cost,
    )


def patch_embedding_pallas(x, w, b, *, patch_size, tile_m=256):
    """PatchEmbedding forward.

    x: (B, C, H, W)  image, NCHW (PyTorch layout)
    w: (E, C, p, p)  Conv2d weight (PyTorch layout), p == patch_size
    b: (E,)          Conv2d bias
    returns: (B, num_patches, E)
    """
    B, C, H, W = x.shape
    E = w.shape[0]
    p = patch_size
    assert H % p == 0 and W % p == 0, "image size must be divisible by patch size"
    gh, gw = H // p, W // p
    N = gh * gw
    K = C * p * p
    M = B * N

    # --- layout plumbing (no FLOPs): patches in (c, kh, kw) order to match Conv2d.
    patches = x.reshape(B, C, gh, p, gw, p)
    patches = patches.transpose(0, 2, 4, 1, 3, 5).reshape(M, K)
    w_t = w.reshape(E, K).T          # (K, E): kernel does plain x @ W + b
    b2d = b.reshape(1, E)

    # --- token-axis tiling: sublane-aligned (x8); when M is small, shrink the
    # tile so the grid keeps >= 2 steps (both v7x TensorCores get work).
    tile_m_eff = min(int(tile_m), max(8, _round_up(pl.cdiv(M, 2), 8)))
    tile_m_eff = _round_up(tile_m_eff, 8)
    M_pad = _round_up(M, tile_m_eff)
    if M_pad != M:
        patches = jnp.pad(patches, ((0, M_pad - M), (0, 0)))

    elem_bytes = jnp.dtype(x.dtype).itemsize

    try:
        call = _build_call(M_pad, K, E, tile_m_eff, x.dtype, elem_bytes,
                           weight_mode=pl.Buffered(1))
        out2d = call(patches, w_t, b2d)
    except Exception:
        # Fallback: default (double-buffered) weight specs if single-buffering
        # via pipeline_mode is not supported by this JAX/Mosaic build.
        call = _build_call(M_pad, K, E, tile_m_eff, x.dtype, elem_bytes,
                           weight_mode=None)
        out2d = call(patches, w_t, b2d)

    return out2d[:M].reshape(B, N, E)


def _reference(x, w, b, patch_size):
    # Exact PyTorch forward: Conv2d(k=stride=p) -> flatten(2) -> transpose(1,2)
    out = jax.lax.conv_general_dilated(
        x, w,
        window_strides=(patch_size, patch_size),
        padding="VALID",
        dimension_numbers=("NCHW", "OIHW", "NCHW"),
        precision=jax.lax.Precision.HIGHEST,
    )
    out = out + b[None, :, None, None]
    B, E, gh, gw = out.shape
    return out.reshape(B, E, gh * gw).transpose(0, 2, 1)


if __name__ == "__main__":
    # Small shapes consistent with the module (ViT-style but tiny).
    B, C, img_size, patch_size, embed_dim = 2, 3, 16, 4, 128

    key = jax.random.PRNGKey(0)
    kx, kw, kb = jax.random.split(key, 3)

    x = jax.random.normal(kx, (B, C, img_size, img_size), dtype=jnp.float32)
    fan_in = C * patch_size * patch_size
    w = jax.random.normal(kw, (embed_dim, C, patch_size, patch_size),
                          dtype=jnp.float32) * (fan_in ** -0.5)
    b = jax.random.normal(kb, (embed_dim,), dtype=jnp.float32) * 0.01

    out = patch_embedding_pallas(x, w, b, patch_size=patch_size, tile_m=256)
    out = jax.block_until_ready(out)

    num_patches = (img_size // patch_size) ** 2
    ref = _reference(x, w, b, patch_size)
    assert out.shape == (B, num_patches, embed_dim), out.shape
    assert jnp.allclose(out, ref, atol=1e-4, rtol=1e-4), \
        float(jnp.max(jnp.abs(out - ref)))

    print("KERNEL_OK")
</pallas_src>

<mosaic_0001>
module attributes {stable_mosaic.version = 11 : i64} {
  func.func @_patch_embed_kernel(%arg0: i32, %arg1: memref<16x48xf32, #tpu.memory_space<vmem>>, %arg2: memref<48x128xf32, #tpu.memory_space<vmem>>, %arg3: memref<1x128xf32, #tpu.memory_space<vmem>>, %arg4: memref<16x128xf32, #tpu.memory_space<vmem>>) attributes {dimension_semantics = [#tpu.dimension_semantics<parallel>], iteration_bounds = array<i64: 2>, scalar_prefetch = 0 : i64, scratch_operands = 0 : i64, tpu.core_type = #tpu.core_type<tc>, window_params = [{transform_indices = @transform_0, window_bounds = array<i64: 16, 48>}, {pipeline_mode = #tpu.pipeline_mode<synchronous>, transform_indices = @transform_1, window_bounds = array<i64: 48, 128>}, {pipeline_mode = #tpu.pipeline_mode<synchronous>, transform_indices = @transform_2, window_bounds = array<i64: 1, 128>}, {transform_indices = @transform_3, window_bounds = array<i64: 16, 128>}]} {
    %c0 = arith.constant 0 : index
    %c0_0 = arith.constant 0 : index
    %0 = vector.load %arg1[%c0, %c0_0] : memref<16x48xf32, #tpu.memory_space<vmem>>, vector<16x48xf32>
    %c0_1 = arith.constant 0 : index
    %c0_2 = arith.constant 0 : index
    %1 = vector.load %arg2[%c0_1, %c0_2] : memref<48x128xf32, #tpu.memory_space<vmem>>, vector<48x128xf32>
    %cst = arith.constant dense<0.000000e+00> : vector<16x128xf32>
    %2 = tpu.matmul %0, %1, %cst {dimension_numbers = #tpu.dot_dimension_numbers<[1], [0], [0], [1], [0, 0, 1, 1], [], []>} : vector<16x48xf32>, vector<48x128xf32>, vector<16x128xf32> -> vector<16x128xf32>
    %c0_3 = arith.constant 0 : index
    %c0_4 = arith.constant 0 : index
    %3 = vector.load %arg3[%c0_3, %c0_4] : memref<1x128xf32, #tpu.memory_space<vmem>>, vector<1x128xf32>
    %4 = vector.broadcast %3 : vector<1x128xf32> to vector<16x128xf32>
    %5 = arith.addf %2, %4 : vector<16x128xf32>
    %c0_5 = arith.constant 0 : index
    %c0_6 = arith.constant 0 : index
    %6 = vector.load %arg4[%c0_5, %c0_6] : memref<16x128xf32, #tpu.memory_space<vmem>>, vector<16x128xf32>
    tpu.vector_store %arg4[%c0_5, %c0_6], %5 {strides = array<i32>} : memref<16x128xf32, #tpu.memory_space<vmem>>, vector<16x128xf32>,
    return
  }
  func.func @transform_0(%arg0: i32) -> (i32, i32) {
    %c0_i32 = arith.constant 0 : i32
    %c0_i32_0 = arith.constant 0 : i32
    return %arg0, %c0_i32 : i32, i32
  }
  func.func @transform_1(%arg0: i32) -> (i32, i32) {
    %c0_i32 = arith.constant 0 : i32
    %c0_i32_0 = arith.constant 0 : i32
    %c0_i32_1 = arith.constant 0 : i32
    return %c0_i32, %c0_i32_0 : i32, i32
  }
  func.func @transform_2(%arg0: i32) -> (i32, i32) {
    %c0_i32 = arith.constant 0 : i32
    %c0_i32_0 = arith.constant 0 : i32
    %c0_i32_1 = arith.constant 0 : i32
    return %c0_i32, %c0_i32_0 : i32, i32
  }
  func.func @transform_3(%arg0: i32) -> (i32, i32) {
    %c0_i32 = arith.constant 0 : i32
    %c0_i32_0 = arith.constant 0 : i32
    return %arg0, %c0_i32 : i32, i32
  }
}

module attributes {stable_mosaic.version = 11 : i64} {
  func.func @_patch_embed_kernel(%arg0: i32, %arg1: memref<16x48xf32, #tpu.memory_space<vmem>>, %arg2: memref<48x128xf32, #tpu.memory_space<vmem>>, %arg3: memref<1x128xf32, #tpu.memory_space<vmem>>, %arg4: memref<16x128xf32, #tpu.memory_space<vmem>>) attributes {dimension_semantics = [#tpu.dimension_semantics<parallel>], iteration_bounds = array<i64: 2>, scalar_prefetch = 0 : i64, scratch_operands = 0 : i64, tpu.core_type = #tpu.core_type<tc>, window_params = [{transform_indices = @transform_0, window_bounds = array<i64: 16, 48>}, {pipeline_mode = #tpu.pipeline_mode<synchronous>, transform_indices = @transform_1, window_bounds = array<i64: 48, 128>}, {pipeline_mode = #tpu.pipeline_mode<synchronous>, transform_indices = @transform_2, window_bounds = array<i64: 1, 128>}, {transform_indices = @transform_3, window_bounds = array<i64: 16, 128>}]} {
    %c0 = arith.constant 0 : index
    %c0_0 = arith.constant 0 : index
    %0 = vector.load %arg1[%c0, %c0_0] : memref<16x48xf32, #tpu.memory_space<vmem>>, vector<16x48xf32>
    %c0_1 = arith.constant 0 : index
    %c0_2 = arith.constant 0 : index
    %1 = vector.load %arg2[%c0_1, %c0_2] : memref<48x128xf32, #tpu.memory_space<vmem>>, vector<48x128xf32>
    %cst = arith.constant dense<0.000000e+00> : vector<16x128xf32>
    %2 = tpu.matmul %0, %1, %cst {dimension_numbers = #tpu.dot_dimension_numbers<[1], [0], [0], [1], [0, 0, 1, 1], [], []>} : vector<16x48xf32>, vector<48x128xf32>, vector<16x128xf32> -> vector<16x128xf32>
    %c0_3 = arith.constant 0 : index
    %c0_4 = arith.constant 0 : index
    %3 = vector.load %arg3[%c0_3, %c0_4] : memref<1x128xf32, #tpu.memory_space<vmem>>, vector<1x128xf32>
    %4 = vector.broadcast %3 : vector<1x128xf32> to vector<16x128xf32>
    %5 = arith.addf %2, %4 : vector<16x128xf32>
    %c0_5 = arith.constant 0 : index
    %c0_6 = arith.constant 0 : index
    %6 = vector.load %arg4[%c0_5, %c0_6] : memref<16x128xf32, #tpu.memory_space<vmem>>, vector<16x128xf32>
    tpu.vector_store %arg4[%c0_5, %c0_6], %5 {strides = array<i32>} : memref<16x128xf32, #tpu.memory_space<vmem>>, vector<16x128xf32>,
    return
  }
  func.func @transform_0(%arg0: i32) -> (i32, i32) {
    %c0_i32 = arith.constant 0 : i32
    %c0_i32_0 = arith.constant 0 : i32
    return %arg0, %c0_i32 : i32, i32
  }
  func.func @transform_1(%arg0: i32) -> (i32, i32) {
    %c0_i32 = arith.constant 0 : i32
    %c0_i32_0 = arith.constant 0 : i32
    %c0_i32_1 = arith.constant 0 : i32
    return %c0_i32, %c0_i32_0 : i32, i32
  }
  func.func @transform_2(%arg0: i32) -> (i32, i32) {
    %c0_i32 = arith.constant 0 : i32
    %c0_i32_0 = arith.constant 0 : i32
    %c0_i32_1 = arith.constant 0 : i32
    return %c0_i32, %c0_i32_0 : i32, i32
  }
  func.func @transform_3(%arg0: i32) -> (i32, i32) {
    %c0_i32 = arith.constant 0 : i32
    %c0_i32_0 = arith.constant 0 : i32
    return %arg0, %c0_i32 : i32, i32
  }
}

</mosaic_0001>

<bundles_post_ra>
// kernel: tpu_custom_call.1
= control target key start
LH: loop header
LB: loop body
LE: loop exit
PB: predicated region body
PF: predicated region fallthrough
CT: control target
= control target key end

     0   :  { %8 = vsyncpa [#allocation3], 0  ;;  %s888_s0 = inlined_call_operand.hbm [shape: f32[32,48], index: 0, kind: input, shape index: {}]   ;;  %s889_s1 = inlined_call_operand.hbm [shape: f32[48,128], index: 1, kind: input, shape index: {}]   ;;  %s890_s2 = inlined_call_operand.vmem [shape: f32[1,128], index: 2, kind: input, shape index: {}]   ;;  %s891_s3 = inlined_call_operand.hbm [shape: f32[32,128], index: 3, kind: output, shape index: {}]  }
   0x1   :  { %10 = vsyncpa [#allocation3 + $0x1], 0 }
   0x2   :  { %11 = vsyncpa [#allocation6], 0 }
   0x3   :  { %12 = vsyncpa [#allocation4], 0 }
   0x4   :  { %14 = vsyncpa [#allocation4 + $0x1], 0  ;;  %s676_s12 = smov 0   ;;  %s678_s13 = smov 0  }
   0x5   :  { %s680_s14 = smov 0   ;;  %s682_s15 = smov 0  }
   0x6 LB: > { %s697_s16 = sadd.s32 4294967295, %s647_s15   ;;  %s402_s17 = sadd.s32 4294967294, %s647_s15   ;;  %s647_s15 = sphi %s682_s15, %s911_s15   ;;  %s643_s14 = sphi %s680_s14, %s910_s14   ;;  %s639_s13 = sphi %s678_s13, %s909_s13   ;;  %s635_s12 = sphi %s676_s12, %s908_s12  }
   0x7   : > { %p40_p0 = scmp.ne.s32.totalorder %s639_s13, %s635_s12  ;;  %p892_p1 = scmp.eq.s32.totalorder %s697_s16, 0 }
   0x8   : > { %p112_p3 = scmp.eq.s32.totalorder %s402_s17, 1  ;;  %p403_p5 = scmp.ge.s32.totalorder %s647_s15, 1 }
   0x9   : > { %p706_p4 = por %p892_p1, %p40_p0  ;;  %p119_p7 = scmp.lt.s32.totalorder %s647_s15, 3 }
   0xa   : > { %p711_p6 = por %p112_p3, %p40_p0  ;;  %s649_s21 = smov [#allocation5]  }
   0xb   : > { %s895_s18 = scalar_select %p706_p4, 1, 0 }
   0xc   : > { %s896_s19 = scalar_select %p711_p6, 1, 0 }
   0xd   : > { %p716_p8 = pnand %p403_p5, %p119_p7  ;;  %s131_s22 = sshll.u32 %s649_s21, 4  ;;  %s720_s22 = int_to_ptr.vmem [resolvable:$true] %s131_s22 }
   0xe   : > { %s732_s24 = sadd.s32 1, %s647_s15   ;;  %s27_s25 = sadd.s32 1, %s643_s14 }
   0xf   : > { %s897_s20 = scalar_select %p716_p8, 1, 0 }
  0x10   : > { %p466_p9 = pneg %p716_p8  ;;  %s24_s26 = ssub.s32 %s647_s15, %s732_s24 }
  0x11   : > { %s519_s29 = scalar_lea.hbm %s889_s1, 768 }
  0x12   : > { %p727_p11 = pnand %p466_p9, %p892_p1  ;;  %p520_p12 = scmp.ne.s32.totalorder %s889_s1, %s519_s29 }
  0x13   : > { %p526_p5 = scmp.lt.u32.totalorder %s519_s29, %s889_s1 }
  0x14   : > { %p521_p13 = pneg %p727_p11 }
  0x16   : > { %p522_p0 = pnand %p521_p13, %p520_p12 }
  0x18   : > { %p523_p3 = pneg %p522_p0 }
  0x1a   : > { %p528_p7 = pnand %p526_p5, %p523_p3 }
  0x1c   : > { %531 = shalt.err (!%p528_p7)
}
  0x1d   : > { %s532_s7 = scalar_lea.vmem %s720_s22, 768  ;;  %p540_p2 = scmp.lt.s32.totalorder %s720_s22, %s720_s22 }
  0x1e   : > { %p533_p9 = scmp.ne.s32.totalorder %s720_s22, %s532_s7  ;;  %p541_p6 = scmp.lt.s32.totalorder %s532_s7, %s532_s7 }
  0x20   : > { %p535_p10 = pnand %p533_p9, %p521_p13  ;;  %p542_p4 = por %p541_p6, %p540_p2 }
  0x22   : > { %p536_p1 = pneg %p535_p10 }
  0x24   : > { %p543_p8 = pnand %p542_p4, %p536_p1 }
  0x26   : > { %546 = shalt.err (!%p543_p8)
}
  0x27   : > { %s650_s8 = smov 128   ;;  %s651_s9 = smov 8  }
  0x28   : > { %469 = dma.hbm_to_vmem [thread:$0]  (!%p727_p11), %s889_s1, 768, %s720_s22, [#allocation6], %s650_s8, %s650_s8, %s651_s9  }
  0x29   : > { %p25_p1 = scmp.eq.s32.totalorder %s24_s26, 0  ;;  %p34_p2 = scmp.ne.s32.totalorder %s643_s14, %s639_s13 }
  0x2a   : > { %p35_p4 = scmp.eq.s32.totalorder %s647_s15, 0  ;;  %p479_p6 = scmp.lt.s32.totalorder %s647_s15, 2 }
  0x2b   : > { %s766_s17 = scalar_select %p25_p1, %s643_s14, %s27_s25  }
  0x2c   : > { %p36_p8 = por %p35_p4, %p34_p2  ;;  %p899_p10 = scmp.eq.s32.totalorder %s697_s16, 1 }
  0x2d   : > { %s148_s23 = sand.u32 1, %s643_s14   ;;  %s421_s27 = sshll.u32 %s647_s15, 8 }
  0x2e   : > { %p770_p12 = por %p899_p10, %p34_p2  ;;  %s406_s28 = sshll.u32 %s148_s23, 4 }
  0x2f   : > { %s779_s4 = scalar_lea.hbm %s888_s0, %s421_s27  ;;  %s152_s22 = scalar_lea.vmem [#allocation2], %s406_s28 }
  0x30   : > { %s159_s25 = sshll.u32 %s152_s22, 4  ;;  %p781_p11 = pnand %p479_p6, %p36_p8  ;;  %s785_s25 = int_to_ptr.vmem [resolvable:$true] %s159_s25 }
  0x31   : > { %s787_s5 = scalar_lea.sflag [#allocation3], %s148_s23  ;;  %s547_s6 = scalar_lea.hbm %s779_s4, 256 }
  0x32   : > { %p548_p13 = scmp.ne.s32.totalorder %s779_s4, %s547_s6  ;;  %p549_p0 = pneg %p781_p11 }
  0x33   : > { %s552_s11 = scalar_lea.hbm %s888_s0, 512  ;;  %p553_p7 = scmp.lt.u32.totalorder %s779_s4, %s888_s0 }
  0x34   : > { %p550_p3 = pnand %p549_p0, %p548_p13  ;;  %p554_p9 = scmp.lt.u32.totalorder %s552_s11, %s547_s6 }
  0x35   : > { %p556_p2 = scmp.lt.u32.totalorder %s547_s6, %s779_s4 }
  0x36   : > { %p551_p5 = pneg %p550_p3  ;;  %p555_p1 = por %p554_p9, %p553_p7 }
  0x38   : > { %p557_p4 = por %p556_p2, %p555_p1 }
  0x3a   : > { %p558_p6 = pnand %p557_p4, %p551_p5 }
  0x3c   : > { %561 = shalt.err (!%p558_p6)
}
  0x3d   : > { %s562_s23 = scalar_lea.vmem %s785_s25, 256  ;;  %s652_s29 = smov [#allocation2]  }
  0x3e   : > { %p563_p8 = scmp.ne.s32.totalorder %s785_s25, %s562_s23  ;;  %s567_s30 = sshll.u32 %s652_s29, 4  ;;  %s568_s30 = int_to_ptr.vmem [resolvable:$false] %s567_s30 }
  0x3f   : > { %s569_s22 = scalar_lea.vmem %s568_s30, 512  ;;  %p570_p3 = scmp.lt.s32.totalorder %s785_s25, %s568_s30 }
  0x40   : > { %p565_p10 = pnand %p563_p8, %p549_p0  ;;  %p571_p7 = scmp.lt.s32.totalorder %s569_s22, %s562_s23 }
  0x42   : > { %p566_p13 = pneg %p565_p10  ;;  %p572_p9 = por %p571_p7, %p570_p3 }
  0x44   : > { %p573_p1 = pnand %p572_p9, %p566_p13 }
  0x46   : > { %576 = shalt.err (!%p573_p1)
}
  0x47   : > { %473 = dma.hbm_to_vmem [thread:$0]  (!%p781_p11), %s779_s4, 256, %s785_s25, %s787_s5, %s650_s8, %s650_s8, %s651_s9  }
  0x48   : > { %p902_p0 = scmp.ne.s32.totalorder %s897_s20, 0 }
  0x49   : > { %s821_s6 = sand.u32 (!%p902_p0), 1, %s639_s13   ;;  %p903_p5 = scmp.ne.s32.totalorder (!%p902_p0), %s895_s18, 0 }
  0x4a   : > { %171 = sbr.rel (%p902_p0) target bundleno = 330 (0x14a), region = 32  ;;  %s410_s7 = sshll.u32 (!%p902_p0), %s821_s6, 4 }
  0x4b   : > { %s174_s10 = scalar_lea.sflag (!%p902_p0), [#allocation3], %s821_s6  ;;  %s177_s11 = scalar_lea.vmem (!%p902_p0), [#allocation2], %s410_s7 }
  0x51   : > { %622 = dma.done.wait (%p903_p5), %s174_s10, 256  }
  0x52   : > { %624 = vsyncadd (%p903_p5), %s174_s10, 4294967040  ;;  %p904_p2 = scmp.eq.s32.totalorder %s697_s16, 0 }
  0x54   : > { %626 = dma.done.wait (%p904_p2), [#allocation6], 768   ;;  %p905_p11 = pmov %p904_p2 }
  0x55   : > { %v208_v0 = vld [vmem:[#allocation5] sm:$0xff]  ;;  %v209_v1 = vld [vmem:[#allocation5 + $0x8] sm:$0xff]  ;;  %v210_v2 = vld [vmem:[#allocation5 + $0x10] sm:$0xff]  ;;  %vm221_vm0 = vcmask 392192   ;;  %s203_s18 = scalar_lea.vmem [#allocation7], %s410_s7  ;;  %s422_s4 = sshll.u32 %s697_s16, 8 }
  0x56   : > { %628 = vsyncadd (%p905_p11), [#allocation6], 4294966528  ;;  %v446_v3 = vpack.c.bf16 %v209_v1, %v208_v0  ;;  %v211_v4 = vld [vmem:[#allocation5 + $0x18] sm:$0xff]  ;;  %v212_v6 = vld [vmem:[#allocation5 + $0x20] sm:$0xff]  ;;  %s319_s20 = sshll.u32 %s203_s18, 4  ;;  %s844_s5 = scalar_lea.hbm %s891_s3, %s422_s4  ;;  %s839_s20 = int_to_ptr.vmem [resolvable:$true] %s319_s20 }
  0x57   : > { %v450_v5 = vpack.c.bf16 %v211_v4, %v210_v2  ;;  %v213_v7 = vld [vmem:[#allocation5 + $0x28] sm:$0xff]  ;;  %v206_v8 = vld [vmem:[%s177_s11] sm:$0xff]  ;;  %s306_s27 = scalar_lea.sflag [#allocation4], %s821_s6  ;;  %s577_s28 = scalar_lea.vmem %s839_s20, 256 }
  0x58   : > { %447 = vmatprep.subr.bf16.mxu0 %v446_v3  ;;  %443 = vmatprep.mubr.msk.f32.mxu0 %vm221_vm0, %v206_v8  ;;  %v454_v9 = vpack.c.bf16 %v213_v7, %v212_v6  ;;  %v207_v10 = vld [vmem:[%s177_s11 + $0x8] sm:$0xff]  ;;  %v413_v11 = vld [vmem:[%s890_s2] ss:$0 sm:$0xff]  ;;  %p578_p4 = scmp.ne.s32.totalorder %s839_s20, %s577_s28  ;;  %s653_s16 = smov [#allocation7]  }
  0x59   : > { %449 = vmatpush3.bf16.msra.mxu0 %v446_v3  ;;  %s581_s23 = sshll.u32 %s653_s16, 4  ;;  %s582_s23 = int_to_ptr.vmem [resolvable:$false] %s581_s23 }
  0x5a   : > { %451 = vmatprep.subr.bf16.mxu0 %v450_v5  ;;  %p579_p6 = pnand %p578_p4, %p770_p12  ;;  %s583_s29 = scalar_lea.vmem %s582_s23, 512 }
  0x5b   : > { %p584_p10 = scmp.lt.s32.totalorder %s839_s20, %s582_s23  ;;  %p585_p13 = scmp.lt.s32.totalorder %s583_s29, %s577_s28 }
  0x5c   : > { %p580_p8 = pneg %p579_p6 }
  0x5d   : > { %453 = vmatpush3.bf16.msra.mxu0 %v450_v5  ;;  %p586_p3 = por %p585_p13, %p584_p10 }
  0x5e   : > { %455 = vmatprep.subr.bf16.mxu0 %v454_v9 }
  0x5f   : > { %p587_p7 = pnand %p586_p3, %p580_p8 }
  0x61   : > { %457 = vmatpush3.bf16.msra.mxu0 %v454_v9 }
  0x64   : > { %444 = vmatmul.mubr.msk.f32.vlgmr.msra.gmra.mrb[0].mxu0 %vm221_vm0, %v207_v10 }
 0x137   : > { %v445_v12 = vpop.f32.mrb[0].mxu0 }
 0x138   : > { %v300_v13 = vadd.f32 %v445_v12, %v413_v11  ;;  %v294_v14 = vpop.f32.mrb[1].mxu0 }
 0x139   : > { %v295_v15 = vadd.f32 %v413_v11, %v294_v14 }
 0x13a   : > { %304 = vst [vmem:[%s203_s18 + $0x8] sm:$0xff] %v300_v13 }
 0x13b   : > { %303 = vst [vmem:[%s203_s18] sm:$0xff] %v295_v15 }
 0x13c   : > { %590 = shalt.err (!%p587_p7)
}
 0x13d   : > { %s591_s30 = scalar_lea.hbm %s844_s5, 256  ;;  %s595_s10 = scalar_lea.hbm %s891_s3, 512 }
 0x13e   : > { %p592_p9 = scmp.ne.s32.totalorder %s844_s5, %s591_s30  ;;  %p596_p5 = scmp.lt.u32.totalorder %s844_s5, %s891_s3 }
 0x13f   : > { %p597_p2 = scmp.lt.u32.totalorder %s595_s10, %s591_s30  ;;  %p599_p4 = scmp.lt.u32.totalorder %s591_s30, %s844_s5 }
 0x140   : > { %p593_p1 = pnand %p592_p9, %p770_p12 }
 0x141   : > { %p598_p11 = por %p597_p2, %p596_p5 }
 0x142   : > { %p594_p0 = pneg %p593_p1 }
 0x143   : > { %p600_p6 = por %p599_p4, %p598_p11 }
 0x145   : > { %p601_p8 = pnand %p600_p6, %p594_p0 }
 0x147   : > { %604 = shalt.err (!%p601_p8)
}
 0x148   : > { %s654_s8 = smov 128   ;;  %s655_s9 = smov 8  }
 0x149   : > { %464 = dma.vmem_to_hbm [thread:$0]  (%p770_p12), %s839_s20, 256, %s844_s5, %s306_s27, %s654_s8, %s654_s8, %s655_s9  }
 0x14a PF: > { %s334_s4 = sand.u32 1, %s635_s12   ;;  %p906_p10 = scmp.ne.s32.totalorder %s896_s19, 0 }
 0x14b   : > { %p907_p13 = scmp.ge.s32.totalorder %s647_s15, 2  ;;  %s335_s25 = scalar_lea.sflag [#allocation4], %s334_s4 }
 0x14d   : > { %p475_p3 = pnand %p907_p13, %p906_p10 }
 0x14f   : > { %630 = dma.done.wait (!%p475_p3), %s335_s25, 256  }
 0x150   : > { %632 = vsyncadd (!%p475_p3), %s335_s25, 4294967040  ;;  %p17_p7 = scmp.ge.s32.totalorder %s732_s24, 4   ;;  %s908_s12 = smov %s639_s13 }
 0x151   : > { %s909_s13 = smov %s643_s14  ;;  %s910_s14 = smov %s766_s17 }
 0x152   : > { %s911_s15 = smov %s732_s24  ;;  %19 = sbr.rel (!%p17_p7) target bundleno = 6 (0x6), region = 81 }
 0x159   :  { %340 = vsyncpa [#allocation3], 1 }
 0x15a   :  { %342 = vsyncpa [#allocation3 + $0x1], 1 }
 0x15b   :  { %343 = vsyncpa [#allocation6], 1 }
 0x15c   :  { %344 = vsyncpa [#allocation4], 1 }
 0x15d   :  { %346 = vsyncpa [#allocation4 + $0x1], 1 }

// kernel: tpu_custom_call.1
= control target key start
LH: loop header
LB: loop body
LE: loop exit
PB: predicated region body
PF: predicated region fallthrough
CT: control target
= control target key end

     0   :  { %8 = vsyncpa [#allocation3], 0  ;;  %s888_s0 = inlined_call_operand.hbm [shape: f32[32,48], index: 0, kind: input, shape index: {}]   ;;  %s889_s1 = inlined_call_operand.hbm [shape: f32[48,128], index: 1, kind: input, shape index: {}]   ;;  %s890_s2 = inlined_call_operand.vmem [shape: f32[1,128], index: 2, kind: input, shape index: {}]   ;;  %s891_s3 = inlined_call_operand.hbm [shape: f32[32,128], index: 3, kind: output, shape index: {}]  }
   0x1   :  { %10 = vsyncpa [#allocation3 + $0x1], 0 }
   0x2   :  { %11 = vsyncpa [#allocation6], 0 }
   0x3   :  { %12 = vsyncpa [#allocation4], 0 }
   0x4   :  { %14 = vsyncpa [#allocation4 + $0x1], 0  ;;  %s676_s12 = smov 0   ;;  %s678_s13 = smov 0  }
   0x5   :  { %s680_s14 = smov 0   ;;  %s682_s15 = smov 0  }
   0x6 LB: > { %s697_s16 = sadd.s32 4294967295, %s647_s15   ;;  %s402_s17 = sadd.s32 4294967294, %s647_s15   ;;  %s647_s15 = sphi %s682_s15, %s911_s15   ;;  %s643_s14 = sphi %s680_s14, %s910_s14   ;;  %s639_s13 = sphi %s678_s13, %s909_s13   ;;  %s635_s12 = sphi %s676_s12, %s908_s12  }
   0x7   : > { %p40_p0 = scmp.ne.s32.totalorder %s639_s13, %s635_s12  ;;  %p892_p1 = scmp.eq.s32.totalorder %s697_s16, 0 }
   0x8   : > { %p112_p3 = scmp.eq.s32.totalorder %s402_s17, 1  ;;  %p403_p5 = scmp.ge.s32.totalorder %s647_s15, 1 }
   0x9   : > { %p706_p4 = por %p892_p1, %p40_p0  ;;  %p119_p7 = scmp.lt.s32.totalorder %s647_s15, 3 }
   0xa   : > { %p711_p6 = por %p112_p3, %p40_p0  ;;  %s649_s21 = smov [#allocation5]  }
   0xb   : > { %s895_s18 = scalar_select %p706_p4, 1, 0 }
   0xc   : > { %s896_s19 = scalar_select %p711_p6, 1, 0 }
   0xd   : > { %p716_p8 = pnand %p403_p5, %p119_p7  ;;  %s131_s22 = sshll.u32 %s649_s21, 4  ;;  %s720_s22 = int_to_ptr.vmem [resolvable:$true] %s131_s22 }
   0xe   : > { %s732_s24 = sadd.s32 1, %s647_s15   ;;  %s27_s25 = sadd.s32 1, %s643_s14 }
   0xf   : > { %s897_s20 = scalar_select %p716_p8, 1, 0 }
  0x10   : > { %p466_p9 = pneg %p716_p8  ;;  %s24_s26 = ssub.s32 %s647_s15, %s732_s24 }
  0x11   : > { %s519_s29 = scalar_lea.hbm %s889_s1, 768 }
  0x12   : > { %p727_p11 = pnand %p466_p9, %p892_p1  ;;  %p520_p12 = scmp.ne.s32.totalorder %s889_s1, %s519_s29 }
  0x13   : > { %p526_p5 = scmp.lt.u32.totalorder %s519_s29, %s889_s1 }
  0x14   : > { %p521_p13 = pneg %p727_p11 }
  0x16   : > { %p522_p0 = pnand %p521_p13, %p520_p12 }
  0x18   : > { %p523_p3 = pneg %p522_p0 }
  0x1a   : > { %p528_p7 = pnand %p526_p5, %p523_p3 }
  0x1c   : > { %531 = shalt.err (!%p528_p7)
}
  0x1d   : > { %s532_s7 = scalar_lea.vmem %s720_s22, 768  ;;  %p540_p2 = scmp.lt.s32.totalorder %s720_s22, %s720_s22 }
  0x1e   : > { %p533_p9 = scmp.ne.s32.totalorder %s720_s22, %s532_s7  ;;  %p541_p6 = scmp.lt.s32.totalorder %s532_s7, %s532_s7 }
  0x20   : > { %p535_p10 = pnand %p533_p9, %p521_p13  ;;  %p542_p4 = por %p541_p6, %p540_p2 }
  0x22   : > { %p536_p1 = pneg %p535_p10 }
  0x24   : > { %p543_p8 = pnand %p542_p4, %p536_p1 }
  0x26   : > { %546 = shalt.err (!%p543_p8)
}
  0x27   : > { %s650_s8 = smov 128   ;;  %s651_s9 = smov 8  }
  0x28   : > { %469 = dma.hbm_to_vmem [thread:$0]  (!%p727_p11), %s889_s1, 768, %s720_s22, [#allocation6], %s650_s8, %s650_s8, %s651_s9  }
  0x29   : > { %p25_p1 = scmp.eq.s32.totalorder %s24_s26, 0  ;;  %p34_p2 = scmp.ne.s32.totalorder %s643_s14, %s639_s13 }
  0x2a   : > { %p35_p4 = scmp.eq.s32.totalorder %s647_s15, 0  ;;  %p479_p6 = scmp.lt.s32.totalorder %s647_s15, 2 }
  0x2b   : > { %s766_s17 = scalar_select %p25_p1, %s643_s14, %s27_s25  }
  0x2c   : > { %p36_p8 = por %p35_p4, %p34_p2  ;;  %p899_p10 = scmp.eq.s32.totalorder %s697_s16, 1 }
  0x2d   : > { %s148_s23 = sand.u32 1, %s643_s14   ;;  %s421_s27 = sshll.u32 %s647_s15, 8 }
  0x2e   : > { %p770_p12 = por %p899_p10, %p34_p2  ;;  %s406_s28 = sshll.u32 %s148_s23, 4 }
  0x2f   : > { %s779_s4 = scalar_lea.hbm %s888_s0, %s421_s27  ;;  %s152_s22 = scalar_lea.vmem [#allocation2], %s406_s28 }
  0x30   : > { %s159_s25 = sshll.u32 %s152_s22, 4  ;;  %p781_p11 = pnand %p479_p6, %p36_p8  ;;  %s785_s25 = int_to_ptr.vmem [resolvable:$true] %s159_s25 }
  0x31   : > { %s787_s5 = scalar_lea.sflag [#allocation3], %s148_s23  ;;  %s547_s6 = scalar_lea.hbm %s779_s4, 256 }
  0x32   : > { %p548_p13 = scmp.ne.s32.totalorder %s779_s4, %s547_s6  ;;  %p549_p0 = pneg %p781_p11 }
  0x33   : > { %s552_s11 = scalar_lea.hbm %s888_s0, 512  ;;  %p553_p7 = scmp.lt.u32.totalorder %s779_s4, %s888_s0 }
  0x34   : > { %p550_p3 = pnand %p549_p0, %p548_p13  ;;  %p554_p9 = scmp.lt.u32.totalorder %s552_s11, %s547_s6 }
  0x35   : > { %p556_p2 = scmp.lt.u32.totalorder %s547_s6, %s779_s4 }
  0x36   : > { %p551_p5 = pneg %p550_p3  ;;  %p555_p1 = por %p554_p9, %p553_p7 }
  0x38   : > { %p557_p4 = por %p556_p2, %p555_p1 }
  0x3a   : > { %p558_p6 = pnand %p557_p4, %p551_p5 }
  0x3c   : > { %561 = shalt.err (!%p558_p6)
}
  0x3d   : > { %s562_s23 = scalar_lea.vmem %s785_s25, 256  ;;  %s652_s29 = smov [#allocation2]  }
  0x3e   : > { %p563_p8 = scmp.ne.s32.totalorder %s785_s25, %s562_s23  ;;  %s567_s30 = sshll.u32 %s652_s29, 4  ;;  %s568_s30 = int_to_ptr.vmem [resolvable:$false] %s567_s30 }
  0x3f   : > { %s569_s22 = scalar_lea.vmem %s568_s30, 512  ;;  %p570_p3 = scmp.lt.s32.totalorder %s785_s25, %s568_s30 }
  0x40   : > { %p565_p10 = pnand %p563_p8, %p549_p0  ;;  %p571_p7 = scmp.lt.s32.totalorder %s569_s22, %s562_s23 }
  0x42   : > { %p566_p13 = pneg %p565_p10  ;;  %p572_p9 = por %p571_p7, %p570_p3 }
  0x44   : > { %p573_p1 = pnand %p572_p9, %p566_p13 }
  0x46   : > { %576 = shalt.err (!%p573_p1)
}
  0x47   : > { %473 = dma.hbm_to_vmem [thread:$0]  (!%p781_p11), %s779_s4, 256, %s785_s25, %s787_s5, %s650_s8, %s650_s8, %s651_s9  }
  0x48   : > { %p902_p0 = scmp.ne.s32.totalorder %s897_s20, 0 }
  0x49   : > { %s821_s6 = sand.u32 (!%p902_p0), 1, %s639_s13   ;;  %p903_p5 = scmp.ne.s32.totalorder (!%p902_p0), %s895_s18, 0 }
  0x4a   : > { %171 = sbr.rel (%p902_p0) target bundleno = 330 (0x14a), region = 32  ;;  %s410_s7 = sshll.u32 (!%p902_p0), %s821_s6, 4 }
  0x4b   : > { %s174_s10 = scalar_lea.sflag (!%p902_p0), [#allocation3], %s821_s6  ;;  %s177_s11 = scalar_lea.vmem (!%p902_p0), [#allocation2], %s410_s7 }
  0x51   : > { %622 = dma.done.wait (%p903_p5), %s174_s10, 256  }
  0x52   : > { %624 = vsyncadd (%p903_p5), %s174_s10, 4294967040  ;;  %p904_p2 = scmp.eq.s32.totalorder %s697_s16, 0 }
  0x54   : > { %626 = dma.done.wait (%p904_p2), [#allocation6], 768   ;;  %p905_p11 = pmov %p904_p2 }
  0x55   : > { %v208_v0 = vld [vmem:[#allocation5] sm:$0xff]  ;;  %v209_v1 = vld [vmem:[#allocation5 + $0x8] sm:$0xff]  ;;  %v210_v2 = vld [vmem:[#allocation5 + $0x10] sm:$0xff]  ;;  %vm221_vm0 = vcmask 392192   ;;  %s203_s18 = scalar_lea.vmem [#allocation7], %s410_s7  ;;  %s422_s4 = sshll.u32 %s697_s16, 8 }
  0x56   : > { %628 = vsyncadd (%p905_p11), [#allocation6], 4294966528  ;;  %v446_v3 = vpack.c.bf16 %v209_v1, %v208_v0  ;;  %v211_v4 = vld [vmem:[#allocation5 + $0x18] sm:$0xff]  ;;  %v212_v6 = vld [vmem:[#allocation5 + $0x20] sm:$0xff]  ;;  %s319_s20 = sshll.u32 %s203_s18, 4  ;;  %s844_s5 = scalar_lea.hbm %s891_s3, %s422_s4  ;;  %s839_s20 = int_to_ptr.vmem [resolvable:$true] %s319_s20 }
  0x57   : > { %v450_v5 = vpack.c.bf16 %v211_v4, %v210_v2  ;;  %v213_v7 = vld [vmem:[#allocation5 + $0x28] sm:$0xff]  ;;  %v206_v8 = vld [vmem:[%s177_s11] sm:$0xff]  ;;  %s306_s27 = scalar_lea.sflag [#allocation4], %s821_s6  ;;  %s577_s28 = scalar_lea.vmem %s839_s20, 256 }
  0x58   : > { %447 = vmatprep.subr.bf16.mxu0 %v446_v3  ;;  %443 = vmatprep.mubr.msk.f32.mxu0 %vm221_vm0, %v206_v8  ;;  %v454_v9 = vpack.c.bf16 %v213_v7, %v212_v6  ;;  %v207_v10 = vld [vmem:[%s177_s11 + $0x8] sm:$0xff]  ;;  %v413_v11 = vld [vmem:[%s890_s2] ss:$0 sm:$0xff]  ;;  %p578_p4 = scmp.ne.s32.totalorder %s839_s20, %s577_s28  ;;  %s653_s16 = smov [#allocation7]  }
  0x59   : > { %449 = vmatpush3.bf16.msra.mxu0 %v446_v3  ;;  %s581_s23 = sshll.u32 %s653_s16, 4  ;;  %s582_s23 = int_to_ptr.vmem [resolvable:$false] %s581_s23 }
  0x5a   : > { %451 = vmatprep.subr.bf16.mxu0 %v450_v5  ;;  %p579_p6 = pnand %p578_p4, %p770_p12  ;;  %s583_s29 = scalar_lea.vmem %s582_s23, 512 }
  0x5b   : > { %p584_p10 = scmp.lt.s32.totalorder %s839_s20, %s582_s23  ;;  %p585_p13 = scmp.lt.s32.totalorder %s583_s29, %s577_s28 }
  0x5c   : > { %p580_p8 = pneg %p579_p6 }
  0x5d   : > { %453 = vmatpush3.bf16.msra.mxu0 %v450_v5  ;;  %p586_p3 = por %p585_p13, %p584_p10 }
  0x5e   : > { %455 = vmatprep.subr.bf16.mxu0 %v454_v9 }
  0x5f   : > { %p587_p7 = pnand %p586_p3, %p580_p8 }
  0x61   : > { %457 = vmatpush3.bf16.msra.mxu0 %v454_v9 }
  0x64   : > { %444 = vmatmul.mubr.msk.f32.vlgmr.msra.gmra.mrb[0].mxu0 %vm221_vm0, %v207_v10 }
 0x137   : > { %v445_v12 = vpop.f32.mrb[0].mxu0 }
 0x138   : > { %v300_v13 = vadd.f32 %v445_v12, %v413_v11  ;;  %v294_v14 = vpop.f32.mrb[1].mxu0 }
 0x139   : > { %v295_v15 = vadd.f32 %v413_v11, %v294_v14 }
 0x13a   : > { %304 = vst [vmem:[%s203_s18 + $0x8] sm:$0xff] %v300_v13 }
 0x13b   : > { %303 = vst [vmem:[%s203_s18] sm:$0xff] %v295_v15 }
 0x13c   : > { %590 = shalt.err (!%p587_p7)
}
 0x13d   : > { %s591_s30 = scalar_lea.hbm %s844_s5, 256  ;;  %s595_s10 = scalar_lea.hbm %s891_s3, 512 }
 0x13e   : > { %p592_p9 = scmp.ne.s32.totalorder %s844_s5, %s591_s30  ;;  %p596_p5 = scmp.lt.u32.totalorder %s844_s5, %s891_s3 }
 0x13f   : > { %p597_p2 = scmp.lt.u32.totalorder %s595_s10, %s591_s30  ;;  %p599_p4 = scmp.lt.u32.totalorder %s591_s30, %s844_s5 }
 0x140   : > { %p593_p1 = pnand %p592_p9, %p770_p12 }
 0x141   : > { %p598_p11 = por %p597_p2, %p596_p5 }
 0x142   : > { %p594_p0 = pneg %p593_p1 }
 0x143   : > { %p600_p6 = por %p599_p4, %p598_p11 }
 0x145   : > { %p601_p8 = pnand %p600_p6, %p594_p0 }
 0x147   : > { %604 = shalt.err (!%p601_p8)
}
 0x148   : > { %s654_s8 = smov 128   ;;  %s655_s9 = smov 8  }
 0x149   : > { %464 = dma.vmem_to_hbm [thread:$0]  (%p770_p12), %s839_s20, 256, %s844_s5, %s306_s27, %s654_s8, %s654_s8, %s655_s9  }
 0x14a PF: > { %s334_s4 = sand.u32 1, %s635_s12   ;;  %p906_p10 = scmp.ne.s32.totalorder %s896_s19, 0 }
 0x14b   : > { %p907_p13 = scmp.ge.s32.totalorder %s647_s15, 2  ;;  %s335_s25 = scalar_lea.sflag [#allocation4], %s334_s4 }
 0x14d   : > { %p475_p3 = pnand %p907_p13, %p906_p10 }
 0x14f   : > { %630 = dma.done.wait (!%p475_p3), %s335_s25, 256  }
 0x150   : > { %632 = vsyncadd (!%p475_p3), %s335_s25, 4294967040  ;;  %p17_p7 = scmp.ge.s32.totalorder %s732_s24, 4   ;;  %s908_s12 = smov %s639_s13 }
 0x151   : > { %s909_s13 = smov %s643_s14  ;;  %s910_s14 = smov %s766_s17 }
 0x152   : > { %s911_s15 = smov %s732_s24  ;;  %19 = sbr.rel (!%p17_p7) target bundleno = 6 (0x6), region = 81 }
 0x159   :  { %340 = vsyncpa [#allocation3], 1 }
 0x15a   :  { %342 = vsyncpa [#allocation3 + $0x1], 1 }
 0x15b   :  { %343 = vsyncpa [#allocation6], 1 }
 0x15c   :  { %344 = vsyncpa [#allocation4], 1 }
 0x15d   :  { %346 = vsyncpa [#allocation4 + $0x1], 1 }

</bundles_post_ra>
